<compile_context>
chip_gen: v7x
topology: tpu7x:2x2x1
jax: 0.10.0
libtpu: 0.0.40
codegen_flags: <defaults>
</compile_context>

<pallas_src>
import jax
import jax.numpy as jnp
import numpy as np
from jax.experimental import pallas as pl
from jax.experimental.pallas import tpu as pltpu


def _round_up(x, m):
    return (x + m - 1) // m * m


def _cdiv(a, b):
    return (a + b - 1) // b


# --------------------------------------------------------------------------- #
# Kernels
# --------------------------------------------------------------------------- #

def _make_vmem_table_kernel(tb):
    """EmbeddingBag(mean) + Linear with the table resident in VMEM; TB bags/step."""

    def kernel(ids_ref, start_ref, end_ref,          # scalar prefetch (SMEM)
               table_ref, w_ref, bias_ref,            # VMEM-resident inputs
               out_ref,                               # (TB, Cp) output block
               pooled_ref, bag_acc):                  # scratch
        base = pl.program_id(0) * tb

        @pl.loop(0, tb)
        def _(bi):
            b = base + bi
            start = start_ref[b]
            n = end_ref[b] - start
            bag_acc[...] = jnp.zeros_like(bag_acc)

            @pl.loop(0, n)
            def _(i):
                tok = ids_ref[start + i]
                bag_acc[...] += table_ref[pl.ds(tok, 1), :].astype(jnp.float32)

            # mean (empty bag -> 0, matching torch); scale BEFORE any downcast.
            inv_len = jnp.where(n > 0, 1.0 / n.astype(jnp.float32), 0.0)
            pooled_ref[pl.ds(bi, 1), :] = bag_acc[...] * inv_len

        pooled = pooled_ref[...]
        if w_ref.dtype != jnp.float32:
            pooled = pooled.astype(w_ref.dtype)        # O(1) after mean scaling
        logits = jnp.dot(pooled, w_ref[...], preferred_element_type=jnp.float32)
        out_ref[...] = (logits + bias_ref[...]).astype(out_ref.dtype)

    return kernel


def _make_hbm_gather_kernel(tb, depth):
    """Same computation, table in HBM; rows gathered with a depth-`depth` DMA ring."""

    def kernel(ids_ref, start_ref, end_ref,          # scalar prefetch (SMEM)
               emb_hbm, w_ref, bias_ref,              # table stays in HBM (pl.ANY)
               out_ref,                               # (TB, Cp) output block
               row_buf, dma_sem, pooled_ref, bag_acc):
        base = pl.program_id(0) * tb

        def row_copy(tok, slot):
            # One descriptor builder used for BOTH start and wait -> identical
            # shape/slice, semaphore byte counts can never desynchronize.
            return pltpu.make_async_copy(emb_hbm.at[pl.ds(tok, 1), :],
                                         row_buf.at[slot],
                                         dma_sem.at[slot])

        @pl.loop(0, tb)
        def _(bi):
            b = base + bi
            start = start_ref[b]
            n = end_ref[b] - start
            bag_acc[...] = jnp.zeros_like(bag_acc)

            # Prime the ring: keep up to `depth` row gathers in flight.
            @pl.loop(0, jnp.minimum(n, depth))
            def _(i):
                row_copy(ids_ref[start + i], i).start()

            @pl.loop(0, n)
            def _(i):
                slot = i & (depth - 1)
                # SMEM id reads happen BEFORE the wait (wait breaks sst->sld fwd).
                tok_i = ids_ref[start + i]             # row in flight for this slot
                nxt = i + depth
                has_next = nxt < n
                nxt_tok = ids_ref[start + jnp.where(has_next, nxt, i)]

                row_copy(tok_i, slot).wait()           # identical descriptor as start
                bag_acc[...] += row_buf[slot].astype(jnp.float32)

                @pl.when(has_next)
                def _():
                    row_copy(nxt_tok, slot).start()    # refill the just-freed slot

            inv_len = jnp.where(n > 0, 1.0 / n.astype(jnp.float32), 0.0)
            pooled_ref[pl.ds(bi, 1), :] = bag_acc[...] * inv_len

        pooled = pooled_ref[...]
        if w_ref.dtype != jnp.float32:
            pooled = pooled.astype(w_ref.dtype)
        logits = jnp.dot(pooled, w_ref[...], preferred_element_type=jnp.float32)
        out_ref[...] = (logits + bias_ref[...]).astype(out_ref.dtype)

    return kernel


# --------------------------------------------------------------------------- #
# Wrappers
# --------------------------------------------------------------------------- #

def prepare_text_sentiment_params(emb_w, fc_w, fc_b, *, param_dtype=None):
    """One-time parameter prep (call at init, NOT per forward): fc transpose/pad,
    bias pad, optional bf16 cast.  The embedding table is not padded or copied."""
    V, E = emb_w.shape
    C = fc_w.shape[0]
    Cp = _round_up(max(C, 1), 128)                 # lane-dense output / weight minor
    dt = emb_w.dtype if param_dtype is None else param_dtype
    emb = emb_w.astype(dt)                          # no column padding, no HBM copy
    w = jnp.pad(jnp.transpose(fc_w).astype(dt), ((0, 0), (0, Cp - C)))    # (E, Cp)
    bias = jnp.pad(fc_b.astype(jnp.float32), (0, Cp - C)).reshape(1, Cp)  # (1, Cp)
    return {"emb": emb, "w": w, "bias": bias, "V": V, "E": E, "C": C, "Cp": Cp}


def _resident_table_budget_bytes():
    phys = 64 << 20                                 # v7x physical VMEM (smallest gen)
    try:
        phys = int(pltpu.get_tpu_info().vmem_capacity_bytes)
    except Exception:
        pass
    # Leave headroom for fc weight, output double-buffers, accumulators.
    return max(phys // 2 - (8 << 20), 4 << 20)


def _pick_tb(batch):
    tb = min(256, _round_up(max(batch, 1), 8))      # fill the MXU M dimension
    if batch >= 16 and _cdiv(batch, tb) < 2:        # keep >=2 steps for v7x's 2 TCs
        tb = _round_up(_cdiv(batch, 2), 8)
    return tb


def text_sentiment_forward(params, text, offsets, *, use_vmem_table=None,
                           gather_depth=4):
    """Forward pass of TextSentiment.

    text:    (N,) int token ids (all bags concatenated, torch 1-D `text`)
    offsets: (B,) int bag start indices (torch `offsets`)
    returns: (B, C) float32 logits
    """
    emb, w, bias = params["emb"], params["w"], params["bias"]
    V, E, C, Cp = params["V"], params["E"], params["C"], params["Cp"]
    N = int(text.shape[0])
    B = int(offsets.shape[0])

    tb = _pick_tb(B)
    num_steps = _cdiv(B, tb)
    Bp = num_steps * tb

    ids = text.astype(jnp.int32)
    starts = offsets.astype(jnp.int32)
    ends = jnp.concatenate([starts[1:], jnp.array([N], jnp.int32)])
    starts = jnp.pad(starts, (0, Bp - B))           # padded bags: start == end == 0
    ends = jnp.pad(ends, (0, Bp - B))

    table_bytes = V * E * emb.dtype.itemsize
    if use_vmem_table is None:
        use_vmem_table = table_bytes <= _resident_table_budget_bytes()

    w_spec = pl.BlockSpec((E, Cp), lambda s, i_r, s_r, e_r: (0, 0))
    b_spec = pl.BlockSpec((1, Cp), lambda s, i_r, s_r, e_r: (0, 0))
    out_spec = pl.BlockSpec((tb, Cp), lambda s, i_r, s_r, e_r: (s, 0))

    cp_kwargs = {"dimension_semantics": ("parallel",)}

    if use_vmem_table:
        kernel = _make_vmem_table_kernel(tb)
        table_spec = pl.BlockSpec((V, E), lambda s, i_r, s_r, e_r: (0, 0))
        scratch = [pltpu.VMEM((tb, E), jnp.float32),       # pooled means (TB, E)
                   pltpu.VMEM((1, E), jnp.float32)]        # per-bag f32 sum
        approx_need = (2 * (table_bytes + int(w.size) * w.dtype.itemsize)
                       + 4 * tb * Cp * 4 + (2 << 20))
        if approx_need > (12 << 20):                       # above default scoped caps
            cp_kwargs["vmem_limit_bytes"] = int(approx_need + (8 << 20))
    else:
        depth = max(2, gather_depth)
        assert depth & (depth - 1) == 0, "gather_depth must be a power of two"
        kernel = _make_hbm_gather_kernel(tb, depth)
        table_spec = pl.BlockSpec(memory_space=pl.ANY)     # table stays in HBM
        scratch = [pltpu.VMEM((depth, 1, E), emb.dtype),   # gathered-row ring
                   pltpu.SemaphoreType.DMA((depth,)),
                   pltpu.VMEM((tb, E), jnp.float32),
                   pltpu.VMEM((1, E), jnp.float32)]

    grid_spec = pltpu.PrefetchScalarGridSpec(
        num_scalar_prefetch=3,                             # ids, starts, ends -> SMEM
        grid=(num_steps,),
        in_specs=[table_spec, w_spec, b_spec],
        out_specs=out_spec,
        scratch_shapes=scratch)

    out = pl.pallas_call(
        kernel,
        out_shape=jax.ShapeDtypeStruct((Bp, Cp), jnp.float32),
        grid_spec=grid_spec,
        compiler_params=pltpu.CompilerParams(**cp_kwargs),
    )(ids, starts, ends, emb, w, bias)

    return out[:B, :C]


def text_sentiment(text, offsets, emb_w, fc_w, fc_b, **kwargs):
    """Convenience wrapper (prefer prepare once + text_sentiment_forward)."""
    return text_sentiment_forward(
        prepare_text_sentiment_params(emb_w, fc_w, fc_b), text, offsets, **kwargs)


# --------------------------------------------------------------------------- #
# Reference + demo
# --------------------------------------------------------------------------- #

def _reference(text_np, offsets_np, emb_w, fc_w, fc_b):
    """Numpy reference matching torch EmbeddingBag(mean) + Linear."""
    N = text_np.shape[0]
    B = offsets_np.shape[0]
    E = np.asarray(emb_w).shape[1]
    ends = np.concatenate([offsets_np[1:], np.array([N], np.int64)])
    rows = np.asarray(emb_w, np.float32)[text_np]
    pooled = np.zeros((B, E), np.float32)
    for b in range(B):
        s, e = int(offsets_np[b]), int(ends[b])
        if e > s:
            pooled[b] = rows[s:e].mean(axis=0)
    return pooled @ np.asarray(fc_w, np.float32).T + np.asarray(fc_b, np.float32)


if __name__ == "__main__":
    # Small synthetic shapes consistent with the module.
    vocabulary_size = 64
    embedding_dimension = 32
    num_class = 4
    batch = 4
    n_tokens = 14

    key = jax.random.PRNGKey(0)
    k_emb, k_fc, k_txt = jax.random.split(key, 3)

    initrange = 0.5
    emb_w = jax.random.uniform(k_emb, (vocabulary_size, embedding_dimension),
                               jnp.float32, -initrange, initrange)
    fc_w = jax.random.uniform(k_fc, (num_class, embedding_dimension),
                              jnp.float32, -initrange, initrange)
    fc_b = jnp.zeros((num_class,), jnp.float32)

    text = jax.random.randint(k_txt, (n_tokens,), 0, vocabulary_size, jnp.int32)
    offsets = jnp.array([0, 3, 7, 10], jnp.int32)      # variable-length bags

    params = prepare_text_sentiment_params(emb_w, fc_w, fc_b)   # prep once
    ref = _reference(np.asarray(text), np.asarray(offsets), emb_w, fc_w, fc_b)

    # VMEM-resident-table fast path (auto-selected for this small table).
    out_vmem = jax.block_until_ready(
        text_sentiment_forward(params, text, offsets, use_vmem_table=True))
    assert out_vmem.shape == (batch, num_class)
    assert np.allclose(np.asarray(out_vmem), ref, atol=1e-4, rtol=1e-4), (
        float(np.abs(np.asarray(out_vmem) - ref).max()))

    # HBM-gather path (used when the table exceeds the per-generation VMEM budget).
    out_hbm = jax.block_until_ready(
        text_sentiment_forward(params, text, offsets, use_vmem_table=False))
    assert out_hbm.shape == (batch, num_class)
    assert np.allclose(np.asarray(out_hbm), ref, atol=1e-4, rtol=1e-4), (
        float(np.abs(np.asarray(out_hbm) - ref).max()))

    print("KERNEL_OK")
</pallas_src>

<mosaic_0001>
module attributes {stable_mosaic.version = 11 : i64} {
  func.func @kernel(%arg0: i32, %arg1: memref<14xi32, #tpu.memory_space<smem>>, %arg2: memref<8xi32, #tpu.memory_space<smem>>, %arg3: memref<8xi32, #tpu.memory_space<smem>>, %arg4: memref<64x32xf32, #tpu.memory_space<vmem>>, %arg5: memref<32x128xf32, #tpu.memory_space<vmem>>, %arg6: memref<1x128xf32, #tpu.memory_space<vmem>>, %arg7: memref<8x128xf32, #tpu.memory_space<vmem>>, %arg8: memref<8x32xf32, #tpu.memory_space<vmem>>, %arg9: memref<1x32xf32, #tpu.memory_space<vmem>>) attributes {dimension_semantics = [#tpu.dimension_semantics<parallel>], iteration_bounds = array<i64: 1>, scalar_prefetch = 3 : i64, scratch_operands = 2 : i64, tpu.core_type = #tpu.core_type<tc>, window_params = [{pipeline_mode = #tpu.pipeline_mode<synchronous>, transform_indices = @transform_0, window_bounds = array<i64: 64, 32>}, {pipeline_mode = #tpu.pipeline_mode<synchronous>, transform_indices = @transform_1, window_bounds = array<i64: 32, 128>}, {pipeline_mode = #tpu.pipeline_mode<synchronous>, transform_indices = @transform_2, window_bounds = array<i64: 1, 128>}, {transform_indices = @transform_3, window_bounds = array<i64: 8, 128>}]} {
    %c8_i32 = arith.constant 8 : i32
    %0 = arith.muli %arg0, %c8_i32 : i32
    %c0_i32 = arith.constant 0 : i32
    %c8_i32_0 = arith.constant 8 : i32
    %1 = arith.addi %c0_i32, %c8_i32_0 : i32
    %c1_i32 = arith.constant 1 : i32
    scf.for %arg10 = %c0_i32 to %1 step %c1_i32  : i32 {
      %c1_i32_9 = arith.constant 1 : i32
      %9 = arith.muli %arg10, %c1_i32_9 : i32
      %c0_i32_10 = arith.constant 0 : i32
      %10 = arith.addi %c0_i32_10, %9 : i32
      %11 = arith.addi %0, %10 : i32
      %12 = arith.index_cast %11 : i32 to index
      %13 = memref.load %arg2[%12] : memref<8xi32, #tpu.memory_space<smem>>
      %14 = arith.index_cast %11 : i32 to index
      %15 = memref.load %arg3[%14] : memref<8xi32, #tpu.memory_space<smem>>
      %16 = arith.subi %15, %13 : i32
      %cst_11 = arith.constant 0.000000e+00 : f32
      %17 = vector.broadcast %cst_11 : f32 to vector<1x32xf32>
      %c0_12 = arith.constant 0 : index
      %c0_13 = arith.constant 0 : index
      %18 = vector.load %arg9[%c0_12, %c0_13] : memref<1x32xf32, #tpu.memory_space<vmem>>, vector<1x32xf32>
      tpu.vector_store %arg9[%c0_12, %c0_13], %17 {strides = array<i32>} : memref<1x32xf32, #tpu.memory_space<vmem>>, vector<1x32xf32>,
      %c0_i32_14 = arith.constant 0 : i32
      %19 = arith.subi %16, %c0_i32_14 : i32
      %c1_i32_15 = arith.constant 1 : i32
      %c1_i32_16 = arith.constant 1 : i32
      %20 = arith.subi %c1_i32_15, %c1_i32_16 : i32
      %21 = arith.addi %19, %20 : i32
      %c1_i32_17 = arith.constant 1 : i32
      %22 = arith.divsi %21, %c1_i32_17 : i32
      %c1_i32_18 = arith.constant 1 : i32
      %c0_i32_19 = arith.constant 0 : i32
      %c0_i32_20 = arith.constant 0 : i32
      %23 = arith.subi %22, %c0_i32_20 : i32
      %24 = arith.addi %c0_i32_20, %23 : i32
      %c1_i32_21 = arith.constant 1 : i32
      scf.for %arg11 = %c0_i32_20 to %24 step %c1_i32_21  : i32 {
        %34 = arith.muli %arg11, %c1_i32_18 : i32
        %35 = arith.addi %c0_i32_19, %34 : i32
        %36 = arith.addi %13, %35 : i32
        %37 = arith.index_cast %36 : i32 to index
        %38 = memref.load %arg1[%37] : memref<14xi32, #tpu.memory_space<smem>>
        %c0_28 = arith.constant 0 : index
        %c0_29 = arith.constant 0 : index
        %39 = vector.load %arg9[%c0_28, %c0_29] : memref<1x32xf32, #tpu.memory_space<vmem>>, vector<1x32xf32>
        %40 = arith.index_cast %38 : i32 to index
        %c0_30 = arith.constant 0 : index
        %41 = vector.load %arg4[%40, %c0_30] : memref<64x32xf32, #tpu.memory_space<vmem>>, vector<1x32xf32>
        %42 = arith.addf %39, %41 : vector<1x32xf32>
        %c0_31 = arith.constant 0 : index
        %c0_32 = arith.constant 0 : index
        %43 = vector.load %arg9[%c0_31, %c0_32] : memref<1x32xf32, #tpu.memory_space<vmem>>, vector<1x32xf32>
        tpu.vector_store %arg9[%c0_31, %c0_32], %42 {strides = array<i32>} : memref<1x32xf32, #tpu.memory_space<vmem>>, vector<1x32xf32>,
      }
      %c0_i32_22 = arith.constant 0 : i32
      %25 = arith.cmpi sgt, %16, %c0_i32_22 : i32
      %26 = arith.sitofp %16 : i32 to f32
      %cst_23 = arith.constant 1.000000e+00 : f32
      %27 = arith.divf %cst_23, %26 : f32
      %cst_24 = arith.constant 0.000000e+00 : f32
      %28 = arith.select %25, %27, %cst_24 : f32
      %c0_25 = arith.constant 0 : index
      %c0_26 = arith.constant 0 : index
      %29 = vector.load %arg9[%c0_25, %c0_26] : memref<1x32xf32, #tpu.memory_space<vmem>>, vector<1x32xf32>
      %30 = vector.broadcast %28 : f32 to vector<1x32xf32>
      %31 = arith.mulf %29, %30 : vector<1x32xf32>
      %32 = arith.index_cast %10 : i32 to index
      %c0_27 = arith.constant 0 : index
      %33 = vector.load %arg8[%32, %c0_27] : memref<8x32xf32, #tpu.memory_space<vmem>>, vector<1x32xf32>
      tpu.vector_store %arg8[%32, %c0_27], %31 {strides = array<i32>} : memref<8x32xf32, #tpu.memory_space<vmem>>, vector<1x32xf32>,
    }
    %c8_i32_1 = arith.constant 8 : i32
    %c0 = arith.constant 0 : index
    %c0_2 = arith.constant 0 : index
    %2 = vector.load %arg8[%c0, %c0_2] : memref<8x32xf32, #tpu.memory_space<vmem>>, vector<8x32xf32>
    %c0_3 = arith.constant 0 : index
    %c0_4 = arith.constant 0 : index
    %3 = vector.load %arg5[%c0_3, %c0_4] : memref<32x128xf32, #tpu.memory_space<vmem>>, vector<32x128xf32>
    %cst = arith.constant dense<0.000000e+00> : vector<8x128xf32>
    %4 = tpu.matmul %2, %3, %cst {dimension_numbers = #tpu.dot_dimension_numbers<[1], [0], [0], [1], [0, 0, 1, 1], [], []>} : vector<8x32xf32>, vector<32x128xf32>, vector<8x128xf32> -> vector<8x128xf32>
    %c0_5 = arith.constant 0 : index
    %c0_6 = arith.constant 0 : index
    %5 = vector.load %arg6[%c0_5, %c0_6] : memref<1x128xf32, #tpu.memory_space<vmem>>, vector<1x128xf32>
    %6 = vector.broadcast %5 : vector<1x128xf32> to vector<8x128xf32>
    %7 = arith.addf %4, %6 : vector<8x128xf32>
    %c0_7 = arith.constant 0 : index
    %c0_8 = arith.constant 0 : index
    %8 = vector.load %arg7[%c0_7, %c0_8] : memref<8x128xf32, #tpu.memory_space<vmem>>, vector<8x128xf32>
    tpu.vector_store %arg7[%c0_7, %c0_8], %7 {strides = array<i32>} : memref<8x128xf32, #tpu.memory_space<vmem>>, vector<8x128xf32>,
    return
  }
  func.func @transform_0(%arg0: i32, %arg1: memref<14xi32, #tpu.memory_space<smem>>, %arg2: memref<8xi32, #tpu.memory_space<smem>>, %arg3: memref<8xi32, #tpu.memory_space<smem>>) -> (i32, i32) {
    %c0_i32 = arith.constant 0 : i32
    %c0_i32_0 = arith.constant 0 : i32
    %c0_i32_1 = arith.constant 0 : i32
    return %c0_i32, %c0_i32_0 : i32, i32
  }
  func.func @transform_1(%arg0: i32, %arg1: memref<14xi32, #tpu.memory_space<smem>>, %arg2: memref<8xi32, #tpu.memory_space<smem>>, %arg3: memref<8xi32, #tpu.memory_space<smem>>) -> (i32, i32) {
    %c0_i32 = arith.constant 0 : i32
    %c0_i32_0 = arith.constant 0 : i32
    %c0_i32_1 = arith.constant 0 : i32
    return %c0_i32, %c0_i32_0 : i32, i32
  }
  func.func @transform_2(%arg0: i32, %arg1: memref<14xi32, #tpu.memory_space<smem>>, %arg2: memref<8xi32, #tpu.memory_space<smem>>, %arg3: memref<8xi32, #tpu.memory_space<smem>>) -> (i32, i32) {
    %c0_i32 = arith.constant 0 : i32
    %c0_i32_0 = arith.constant 0 : i32
    %c0_i32_1 = arith.constant 0 : i32
    return %c0_i32, %c0_i32_0 : i32, i32
  }
  func.func @transform_3(%arg0: i32, %arg1: memref<14xi32, #tpu.memory_space<smem>>, %arg2: memref<8xi32, #tpu.memory_space<smem>>, %arg3: memref<8xi32, #tpu.memory_space<smem>>) -> (i32, i32) {
    %c0_i32 = arith.constant 0 : i32
    %c0_i32_0 = arith.constant 0 : i32
    return %arg0, %c0_i32 : i32, i32
  }
}

</mosaic_0001>

<bundles_post_ra>
// kernel: tpu_custom_call.1
= control target key start
LH: loop header
LB: loop body
LE: loop exit
PB: predicated region body
PF: predicated region fallthrough
CT: control target
= control target key end

     0   :  { %s409_s0 = inlined_call_operand.vmem [shape: s32[14], index: 0, kind: input, shape index: {}]   ;;  %s410_s3 = inlined_call_operand.vmem [shape: f32[64,32], index: 3, kind: input, shape index: {}]   ;;  %s411_s4 = inlined_call_operand.vmem [shape: f32[32,128], index: 4, kind: input, shape index: {}]   ;;  %s412_s5 = inlined_call_operand.vmem [shape: f32[1,128], index: 5, kind: input, shape index: {}]   ;;  %s413_s6 = inlined_call_operand.hbm [shape: f32[8,128], index: 6, kind: output, shape index: {}]   ;;  %s414_s1 = inlined_call_operand.vmem [shape: s32[8], index: 1, kind: input, shape index: {}]   ;;  %s415_s2 = inlined_call_operand.vmem [shape: s32[8], index: 2, kind: input, shape index: {}]  }
   0x1   :  { %s11_s23 = sshll.u32 %s409_s0, 4  ;;  %s15_s26 = sshll.u32 %s414_s1, 4  ;;  %s12_s23 = int_to_ptr.vmem [resolvable:$true] %s11_s23  ;;  %s16_s26 = int_to_ptr.vmem [resolvable:$true] %s15_s26 }
   0x2   :  { %s235_s27 = scalar_lea.vmem %s12_s23, 16  ;;  %p240_p1 = scmp.lt.s32.totalorder %s12_s23, %s12_s23 }
   0x3   :  { %p236_p0 = scmp.ne.s32.totalorder %s12_s23, %s235_s27  ;;  %p241_p2 = scmp.lt.s32.totalorder %s235_s27, %s235_s27 }
   0x5   :  { %p242_p3 = por %p241_p2, %p240_p1 }
   0x7   :  { %p243_p4 = pnand %p242_p3, %p236_p0 }
   0x9   :  { %246 = shalt.err (!%p243_p4)  }
   0xa   :  { %s313_s28 = smov [#allocation5]   ;;  %s247_s29 = scalar_lea.vmem %s16_s26, 16 }
   0xb   :  { %14 = dma.vmem_to_smem %s12_s23, 16, %s313_s28, [#allocation4] }
   0xc   :  { %p248_p5 = scmp.ne.s32.totalorder %s16_s26, %s247_s29  ;;  %p252_p6 = scmp.lt.s32.totalorder %s16_s26, %s16_s26 }
   0xd   :  { %p253_p7 = scmp.lt.s32.totalorder %s247_s29, %s247_s29 }
   0xf   :  { %p254_p8 = por %p253_p7, %p252_p6 }
  0x11   :  { %p255_p9 = pnand %p254_p8, %p248_p5 }
  0x13   :  { %258 = shalt.err (!%p255_p9)  }
  0x14   :  { %s314_s0 = smov [#allocation6]   ;;  %s19_s7 = sshll.u32 %s415_s2, 4  ;;  %s20_s7 = int_to_ptr.vmem [resolvable:$true] %s19_s7 }
  0x15   :  { %18 = dma.vmem_to_smem %s16_s26, 16, %s314_s0, [#allocation4] }
  0x16   :  { %s259_s8 = scalar_lea.vmem %s20_s7, 16  ;;  %p264_p11 = scmp.lt.s32.totalorder %s20_s7, %s20_s7 }
  0x17   :  { %p260_p10 = scmp.ne.s32.totalorder %s20_s7, %s259_s8  ;;  %p265_p12 = scmp.lt.s32.totalorder %s259_s8, %s259_s8 }
  0x19   :  { %p266_p13 = por %p265_p12, %p264_p11 }
  0x1b   :  { %p267_p0 = pnand %p266_p13, %p260_p10 }
  0x1d   :  { %270 = shalt.err (!%p267_p0)  }
  0x1e   :  { %s315_s9 = smov [#allocation7]  }
  0x1f   :  { %22 = dma.vmem_to_smem %s20_s7, 16, %s315_s9, [#allocation4] }
  0x20   :  { %301 = dma.done.wait [#allocation4], 48 }
  0x21   :  { %302 = vsyncadd [#allocation4], 4294967248 }
  0x22   :  { %24 = sfence }
  0x23   :  { %25 = vsyncpa [#allocation9], 0  ;;  %s365_s10 = smov 0  }
  0x24 LB: > { %vm43_vm0 = vcmask 253952   ;;  %v316_v0 = vmov 0.0   ;;  %s40_s2 = sld [smem:[#allocation6 + %s307_s10]]  ;;  %s307_s10 = sphi %s365_s10, %s38_s10  }
  0x25   : > { %44 = vst.msk [vmem:[#allocation3] sm:$0x1] %vm43_vm0, %v316_v0  ;;  %s41_s11 = sld [smem:[#allocation7 + %s307_s10]] }
  0x2b   : > { %s42_s12 = ssub.s32 %s41_s11, %s40_s2 }
  0x2c   : > { %p182_p1 = scmp.le.s32.totalorder %s42_s12, 0 }
  0x2d   : > { %s309_s13 = smov (!%p182_p1), 0  }
  0x2e   : > { %174 = sbr.rel (%p182_p1) target bundleno = 65 (0x41), region = 42 }
  0x35 LB: >> { %s51_s14 = sadd.s32 %s311_s13, %s40_s2  ;;  %v53_v1 = vld [vmem:[#allocation3] sm:$0x1]  ;;  %s48_s13 = sadd.s32 1, %s311_s13   ;;  %s311_s13 = sphi %s309_s13, %s48_s13  }
  0x36   : >> { %s52_s15 = sld [smem:[#allocation5 + %s51_s14]]  ;;  %p47_p2 = scmp.ge.s32.totalorder %s48_s13, %s42_s12 }
  0x3a   : > { %50 = sbr.rel (!%p47_p2) target bundleno = 53 (0x35), region = 48 }
  0x3c   : >> { %s54_s18 = scalar_lea.vmem %s410_s3, %s52_s15 }
  0x3d   : >> { %v55_v2 = vld [vmem:[%s54_s18] sm:$0x1] }
  0x3e   : >> { %v56_v3 = vadd.f32 %v55_v2, %v53_v1 }
  0x40   : >> { %57 = vst.msk [vmem:[#allocation3] sm:$0x1] %vm43_vm0, %v56_v3 }
  0x41 PF: > { %s59_s19 = scvt.s32.f32 %s42_s12  ;;  %p58_p3 = scmp.gt.s32.totalorder %s42_s12, 0 }
  0x42   : > { %s67_s21 = scalar_lea.vmem [#allocation2], %s307_s10  ;;  %s38_s10 = sadd.s32 1, %s307_s10  }
  0x43   : > { %v60_v4 = vstv %s59_s19  ;;  %p35_p4 = scmp.ge.s32.totalorder %s38_s10, 8  }
  0x44   : > { %233 = vrcp.f32 %v60_v4  ;;  %v70_v9 = vld [vmem:[%s411_s4] sm:$0xff] (%p35_p4)  ;;  %v71_v10 = vld [vmem:[%s411_s4 + $0x8] sm:$0xff] (%p35_p4)  ;;  %v72_v11 = vld [vmem:[%s411_s4 + $0x10] sm:$0xff] (%p35_p4)  ;;  %v317_v12 = vmov (%p35_p4), 0.0|0.0   ;;  %vm318_vm1 = vmmov (%p35_p4), 0   ;;  %v319_v15 = vmov (%p35_p4), 0.0  }
  0x45   :  { %201 = vmatprep.subr.bf16.mxu0 (%p35_p4), %v317_v12  ;;  %v202_v13 = vpack.c.bf16 (%p35_p4), %v71_v10, %v70_v9  ;;  %v73_v14 = vld [vmem:[%s411_s4 + $0x18] sm:$0xff] (%p35_p4)  ;;  %198 = vmatprep.mubr.msk.f32.mxu0 (%p35_p4), %vm318_vm1, %v319_v15  ;;  %vm81_vm2 = vcmask (%p35_p4), 261120   ;;  %v183_v18 = vld [vmem:[%s412_s5] ss:$0 sm:$0xff] (%p35_p4)  ;;  %s320_s1 = smov (%p35_p4), [#allocation8]  }
  0x46   :  { %v205_v16 = vpack.c.bf16 (%p35_p4), %v73_v14, %v72_v11  ;;  %s162_s30 = sshll.u32 (%p35_p4), %s320_s1, 4  ;;  %s163_s30 = int_to_ptr.vmem [resolvable:$true] %s162_s30 }
  0x47   : > { %v64_v6 = vld [vmem:[#allocation3] sm:$0x1]  ;;  %203 = vmatpush3.bf16.msra.mxu0 (%p35_p4), %v202_v13  ;;  %s271_s4 = scalar_lea.vmem (%p35_p4), %s163_s30, 128  ;;  %p276_p6 = scmp.lt.s32.totalorder (%p35_p4), %s163_s30, %s163_s30 }
  0x48   :  { %204 = vmatprep.subr.bf16.mxu0 (%p35_p4), %v317_v12  ;;  %p272_p5 = scmp.ne.s32.totalorder (%p35_p4), %s163_s30, %s271_s4  ;;  %p277_p7 = scmp.lt.s32.totalorder (%p35_p4), %s271_s4, %s271_s4 }
  0x4a   :  { %p278_p8 = por (%p35_p4), %p277_p7, %p276_p6 }
  0x4b   :  { %206 = vmatpush3.bf16.msra.mxu0 (%p35_p4), %v205_v16 }
  0x4c   :  { %p279_p9 = pnand (%p35_p4), %p278_p8, %p272_p5 }
  0x4e   : > { %v234_v5 = vpop.eup %233 }
  0x4f   : > { %207 = vpush %v234_v5 }
  0x7f   :  { %37 = sbr.rel (!%p35_p4) target bundleno = 36 (0x24), region = 59 }
  0x80   : > { %s208_s20 = spop %207 }
  0x81   : > { %s417_s20 = smov (!%p58_p3, %s208_s20), 0.0 }
  0x82   : > { %v65_v7 = vstv %s417_s20 }
  0x83   : > { %v66_v8 = vmul.f32 %v65_v7, %v64_v6 }
  0x85   : > { %68 = vst.msk [vmem:[%s67_s21] sm:$0x1] %vm43_vm0, %v66_v8 }
  0x8c   :  { %v69_v17 = vld [vmem:[#allocation2] sm:$0xff] }
  0x8d   :  { %199 = vmatmul.mubr.msk.f32.vlgmr.msra.gmra.mrb[0].mxu0 %vm81_vm2, %v69_v17 }
 0x160   :  { %v151_v19 = vpop.f32.mrb[0].mxu0 }
 0x161   :  { %v152_v20 = vadd.f32 %v183_v18, %v151_v19  ;;  %v200_v21 = vpop.f32.mrb[1].mxu0 }
 0x163   :  { %155 = vst [vmem:[#allocation8] sm:$0xff] %v152_v20 }
 0x164   :  { %282 = shalt.err (!%p279_p9)
}
 0x165   :  { %s283_s9 = scalar_lea.hbm %s413_s6, 128 }
 0x166   :  { %p284_p10 = scmp.ne.s32.totalorder %s413_s6, %s283_s9  ;;  %p287_p11 = scmp.lt.u32.totalorder %s283_s9, %s413_s6 }
 0x168   :  { %p289_p12 = pnand %p287_p11, %p284_p10 }
 0x16a   :  { %292 = shalt.err (!%p289_p12)
}
 0x16b   :  { %165 = dma.vmem_to_hbm [thread:$0]  %s163_s30, 128, %s413_s6, [#allocation9]  }
 0x16c   :  { %303 = dma.done.wait [#allocation9], 128  }
 0x16d   :  { %304 = vsyncadd [#allocation9], 4294967168 }
 0x16e   :  { %169 = vsyncpa [#allocation9], 1 }

</bundles_post_ra>
